<compile_context>
chip_gen: v7x
topology: tpu7x:2x2x1
jax: 0.10.0
libtpu: 0.0.40
codegen_flags: <defaults>
</compile_context>

<pallas_src>
from functools import partial

import jax
import jax.numpy as jnp
from jax import lax
from jax.experimental import pallas as pl
from jax.experimental.pallas import tpu as pltpu

_BN_EPS = 1e-5

# Odd 32-bit mixing constants (expressed as int32-compatible Python ints).
_HASH_C1 = 0x7FEB352D
_HASH_C2 = 0x846CA68B - (1 << 32)
_HASH_C3 = 0x27D4EB2F


def _round_up(x, m):
    return ((x + m - 1) // m) * m


def _dropout_keep_mask(shape, row0, seed, n_cols):
    """Bernoulli(0.5) keep-mask from a stateless int32 hash.

    Uses only plain jnp int32 ops (xor / wrapping mul / shift) so it lowers on
    Mosaic TPU *and* in interpret mode (pltpu.prng_* does not). Bit stream
    differs from torch's RNG; the distribution is identical.
    """
    r = lax.broadcasted_iota(jnp.int32, shape, 0) + row0
    c = lax.broadcasted_iota(jnp.int32, shape, 1)
    z = (r * n_cols + c) ^ seed
    z = z * jnp.int32(_HASH_C1)
    z = z ^ (z >> 15)
    z = z * jnp.int32(_HASH_C2)
    z = z ^ (z >> 13)
    z = z * jnp.int32(_HASH_C3)
    z = z ^ (z >> 16)
    return (z & jnp.int32(1)) == 0


def _fused_branch_kernel(seed_ref, wa_ref, x_ref, g_ref, b_ref, o_ref, *,
                         n_valid, training):
    """Rows of H = (W@A) @ X -> BatchNorm(train stats) -> ReLU -> Dropout."""
    # Single fused MXU matmul: bf16 operands, f32 accumulate.
    h = jnp.dot(wa_ref[...], x_ref[...], preferred_element_type=jnp.float32)
    tile_f, n_pad = h.shape

    if training:
        # BatchNorm1d training-mode statistics: per feature row over the
        # n_valid real sample columns (lane-padding excluded), biased variance.
        if n_valid == n_pad:
            mean = jnp.mean(h, axis=1, keepdims=True)
            cent = h - mean
            var = jnp.mean(cent * cent, axis=1, keepdims=True)
        else:
            col = lax.broadcasted_iota(jnp.int32, h.shape, 1)
            valid = col < n_valid
            inv_n = jnp.float32(1.0 / n_valid)
            mean = jnp.sum(jnp.where(valid, h, 0.0), axis=1, keepdims=True) * inv_n
            cent = jnp.where(valid, h - mean, 0.0)
            var = jnp.sum(cent * cent, axis=1, keepdims=True) * inv_n
        h = (h - mean) * lax.rsqrt(var + _BN_EPS)
    else:
        # Running stats at their PyTorch-init values (mean=0, var=1).
        # TODO(synk): running-stat buffer updates (train-time side effect) not modeled.
        h = h * jnp.float32(1.0 / (1.0 + _BN_EPS) ** 0.5)

    # BN affine. In training mode the wrapper pre-folds the dropout 1/(1-p)=2
    # scale into gamma/beta, so dropout below is a bare select.
    h = h * g_ref[...] + b_ref[...]
    h = jnp.maximum(h, 0.0)

    if training:
        row0 = pl.program_id(0) * tile_f
        keep = _dropout_keep_mask(h.shape, row0, seed_ref[0], n_pad)
        h = jnp.where(keep, h, 0.0)

    o_ref[...] = h.astype(o_ref.dtype)


def _run_fused(WA, X, gamma, beta, seed, *, training, tile_f=None):
    """One pallas_call for a stack of branch rows sharing the same X.

    WA    : (F_stack, F_in)  fused weights (W @ A), branch rows stacked
    X     : (F_in, N)        shared input features
    gamma : (F_stack, 1)     BN scale (dropout scale pre-folded when training)
    beta  : (F_stack, 1)     BN shift
    seed  : (1,) int32       dropout seed (scalar prefetch -> SMEM)
    """
    f_stack, f_in = WA.shape
    _, n = X.shape

    n_pad = _round_up(n, 128)                      # lane-dense output width
    if tile_f is None:
        tile_f = min(512, _round_up(f_stack, 8))   # sublane-aligned row tile
    f_pad = _round_up(f_stack, tile_f)

    WA_p = jnp.pad(WA, ((0, f_pad - f_stack), (0, 0))).astype(jnp.bfloat16)
    X_p = jnp.pad(X, ((0, 0), (0, n_pad - n))).astype(jnp.bfloat16)
    g_p = jnp.pad(gamma, ((0, f_pad - f_stack), (0, 0))).astype(jnp.float32)
    b_p = jnp.pad(beta, ((0, f_pad - f_stack), (0, 0))).astype(jnp.float32)

    kernel = partial(_fused_branch_kernel, n_valid=n, training=training)

    flops = 2 * f_pad * f_in * n_pad
    bytes_accessed = (WA_p.size * 2 + X_p.size * 2
                      + (g_p.size + b_p.size) * 4 + f_pad * n_pad * 4)

    out = pl.pallas_call(
        kernel,
        out_shape=jax.ShapeDtypeStruct((f_pad, n_pad), jnp.float32),
        grid_spec=pltpu.PrefetchScalarGridSpec(
            num_scalar_prefetch=1,                       # seed -> SMEM
            grid=(f_pad // tile_f,),
            in_specs=[
                pl.BlockSpec((tile_f, f_in), lambda i, s: (i, 0)),   # WA rows
                pl.BlockSpec((f_in, n_pad), lambda i, s: (0, 0)),    # X (full, for BN)
                pl.BlockSpec((tile_f, 1), lambda i, s: (i, 0)),      # gamma
                pl.BlockSpec((tile_f, 1), lambda i, s: (i, 0)),      # beta
            ],
            out_specs=pl.BlockSpec((tile_f, n_pad), lambda i, s: (i, 0)),
        ),
        compiler_params=pltpu.CompilerParams(
            dimension_semantics=("parallel",),
            vmem_limit_bytes=48 * 1024 * 1024),
        cost_estimate=pl.CostEstimate(
            flops=flops, transcendentals=0, bytes_accessed=bytes_accessed),
    )(seed, WA_p, X_p, g_p, b_p)
    return out


# ---------------------------------------------------------------------------
# Parameter init (mirrors the PyTorch __init__ shapes)
# ---------------------------------------------------------------------------
def _xavier_uniform(key, fan_in, fan_out):
    bound = jnp.sqrt(6.0 / (fan_in + fan_out))
    return jax.random.uniform(key, (fan_out, fan_in), jnp.float32,
                              minval=-bound, maxval=bound)


def init_params(key, f_u, f_v):
    k = jax.random.split(key, 4)
    return {
        # GCN weights (the ones actually used by forward)
        "GCN_u.W": _xavier_uniform(k[0], f_u, f_u),
        "GCN_v.W": _xavier_uniform(k[1], f_v, f_v),
        # SynOmicsLayer.W_u / W_v exist in __init__ but are unused in forward.
        "W_u": _xavier_uniform(k[2], f_u, f_u),
        "W_v": _xavier_uniform(k[3], f_v, f_v),
        # BatchNorm affine params (PyTorch init: ones / zeros), stored as (F,1)
        "bn_u.gamma": jnp.ones((f_u, 1), jnp.float32),
        "bn_u.beta": jnp.zeros((f_u, 1), jnp.float32),
        "bn_v.gamma": jnp.ones((f_v, 1), jnp.float32),
        "bn_v.beta": jnp.zeros((f_v, 1), jnp.float32),
    }


# ---------------------------------------------------------------------------
# SynOmicsLayer.forward
# ---------------------------------------------------------------------------
def syn_omics_forward(params, X_u, X_v, A_u, A_v, A_uv, *, training=True,
                      dropout_seed=0):
    W_u = params["GCN_u.W"]
    W_v = params["GCN_v.W"]
    gu, bu = params["bn_u.gamma"], params["bn_u.beta"]
    gv, bv = params["bn_v.gamma"], params["bn_v.beta"]

    f_u = W_u.shape[0]
    f_v = W_v.shape[0]
    n = X_u.shape[1]

    # One-time fused weights (plain XLA, O(F^3), amortized over N samples).
    WA_u = W_u @ A_u                              # H_u  <- X_u
    WA_v = W_v @ A_v                              # H_v  <- X_v
    WA_vu = W_u @ A_uv                            # H_vu <- X_v
    WA_uv = jnp.einsum("ij,kj->ik", W_v, A_uv)    # W_v @ A_uv.T (no transpose materialized), H_uv <- X_u

    scale = 2.0 if training else 1.0              # dropout 1/(1-p), folded into BN affine

    # Branches sharing X_u: output rows [H_u (F_u) ; H_uv (F_v)]
    WA_xu = jnp.concatenate([WA_u, WA_uv], axis=0)
    g_xu = jnp.concatenate([gu, gv], axis=0) * scale
    b_xu = jnp.concatenate([bu, bv], axis=0) * scale
    # Branches sharing X_v: output rows [H_v (F_v) ; H_vu (F_u)]
    WA_xv = jnp.concatenate([WA_v, WA_vu], axis=0)
    g_xv = jnp.concatenate([gv, gu], axis=0) * scale
    b_xv = jnp.concatenate([bv, bu], axis=0) * scale

    seed_u = jnp.asarray(dropout_seed, jnp.int32).reshape(1)
    seed_v = jnp.asarray(dropout_seed + 1, jnp.int32).reshape(1)

    out_u = _run_fused(WA_xu, X_u, g_xu, b_xu, seed_u, training=training)
    out_v = _run_fused(WA_xv, X_v, g_xv, b_xv, seed_v, training=training)

    H_u = out_u[:f_u, :n]
    H_uv = out_u[f_u:f_u + f_v, :n]
    H_v = out_v[:f_v, :n]
    H_vu = out_v[f_v:f_v + f_u, :n]
    return H_u, H_v, H_vu, H_uv


if __name__ == "__main__":
    F_u, F_v, N = 8, 16, 32

    key = jax.random.PRNGKey(0)
    keys = jax.random.split(key, 6)

    # Node features: (in_features, num_samples)
    X_u = jax.random.normal(keys[0], (F_u, N), jnp.float32)
    X_v = jax.random.normal(keys[1], (F_v, N), jnp.float32)

    # Dense adjacency matrices (PyTorch converts to COO then sparse.mm —
    # numerically identical to a dense matmul).
    A_u = (jax.random.uniform(keys[2], (F_u, F_u)) > 0.5).astype(jnp.float32)
    A_v = (jax.random.uniform(keys[3], (F_v, F_v)) > 0.5).astype(jnp.float32)
    A_uv = (jax.random.uniform(keys[4], (F_u, F_v)) > 0.5).astype(jnp.float32)

    params = init_params(keys[5], F_u, F_v)

    # --- training-mode forward (batch-stats BN + dropout) ---
    outs = syn_omics_forward(params, X_u, X_v, A_u, A_v, A_uv,
                             training=True, dropout_seed=1234)
    outs = jax.block_until_ready(outs)
    H_u, H_v, H_vu, H_uv = outs
    assert H_u.shape == (F_u, N) and H_v.shape == (F_v, N)
    assert H_vu.shape == (F_u, N) and H_uv.shape == (F_v, N)
    assert all(bool(jnp.isfinite(h).all()) for h in outs)

    # --- eval-mode forward: deterministic, sanity-check vs. plain-JAX ref ---
    outs_eval = jax.block_until_ready(
        syn_omics_forward(params, X_u, X_v, A_u, A_v, A_uv, training=False))

    def _ref_branch(W, A, X, g, b):
        h = W @ (A @ X)
        h = h * (1.0 / jnp.sqrt(1.0 + _BN_EPS))   # eval BN at init running stats
        return jnp.maximum(h * g + b, 0.0)

    refs = (
        _ref_branch(params["GCN_u.W"], A_u, X_u, params["bn_u.gamma"], params["bn_u.beta"]),
        _ref_branch(params["GCN_v.W"], A_v, X_v, params["bn_v.gamma"], params["bn_v.beta"]),
        _ref_branch(params["GCN_u.W"], A_uv, X_v, params["bn_u.gamma"], params["bn_u.beta"]),
        _ref_branch(params["GCN_v.W"], A_uv.T, X_u, params["bn_v.gamma"], params["bn_v.beta"]),
    )
    for got, ref in zip(outs_eval, refs):
        # loose tolerance: bf16 MXU operands vs f32 reference
        assert jnp.allclose(got, ref, rtol=1e-1, atol=2e-1), \
            float(jnp.abs(got - ref).max())

    print("KERNEL_OK")
</pallas_src>

<mosaic_0001>
module attributes {stable_mosaic.version = 11 : i64} {
  func.func @_fused_branch_kernel(%arg0: i32, %arg1: memref<1xi32, #tpu.memory_space<smem>>, %arg2: memref<24x8xbf16, #tpu.memory_space<vmem>>, %arg3: memref<8x128xbf16, #tpu.memory_space<vmem>>, %arg4: memref<24x1xf32, #tpu.memory_space<vmem>>, %arg5: memref<24x1xf32, #tpu.memory_space<vmem>>, %arg6: memref<24x128xf32, #tpu.memory_space<vmem>>) attributes {dimension_semantics = [#tpu.dimension_semantics<parallel>], iteration_bounds = array<i64: 1>, scalar_prefetch = 1 : i64, scratch_operands = 0 : i64, tpu.core_type = #tpu.core_type<tc>, window_params = [{transform_indices = @transform_0, window_bounds = array<i64: 24, 8>}, {pipeline_mode = #tpu.pipeline_mode<synchronous>, transform_indices = @transform_1, window_bounds = array<i64: 8, 128>}, {transform_indices = @transform_2, window_bounds = array<i64: 24, 1>}, {transform_indices = @transform_3, window_bounds = array<i64: 24, 1>}, {transform_indices = @transform_4, window_bounds = array<i64: 24, 128>}]} {
    %c0 = arith.constant 0 : index
    %c0_0 = arith.constant 0 : index
    %0 = vector.load %arg2[%c0, %c0_0] : memref<24x8xbf16, #tpu.memory_space<vmem>>, vector<24x8xbf16>
    %c0_1 = arith.constant 0 : index
    %c0_2 = arith.constant 0 : index
    %1 = vector.load %arg3[%c0_1, %c0_2] : memref<8x128xbf16, #tpu.memory_space<vmem>>, vector<8x128xbf16>
    %cst = arith.constant dense<0.000000e+00> : vector<24x128xf32>
    %2 = tpu.matmul %0, %1, %cst {dimension_numbers = #tpu.dot_dimension_numbers<[1], [0], [0], [1], [0, 0, 1, 1], [], []>} : vector<24x8xbf16>, vector<8x128xbf16>, vector<24x128xf32> -> vector<24x128xf32>
    %3 = tpu.iota {dimensions = array<i32: 1>} : vector<24x128xi32>
    %c32_i32 = arith.constant 32 : i32
    %4 = vector.broadcast %c32_i32 : i32 to vector<24x128xi32>
    %5 = arith.cmpi slt, %3, %4 : vector<24x128xi32>
    %cst_3 = arith.constant 0.000000e+00 : f32
    %6 = vector.broadcast %cst_3 : f32 to vector<24x128xf32>
    %7 = arith.select %5, %2, %6 : vector<24x128xi1>, vector<24x128xf32>
    %cst_4 = arith.constant dense<0.000000e+00> : vector<24xf32>
    %8 = vector.multi_reduction <add>, %7, %cst_4 [1] : vector<24x128xf32> to vector<24xf32>
    %9 = vector.shape_cast %8 : vector<24xf32> to vector<24x1xf32>
    %cst_5 = arith.constant 3.125000e-02 : f32
    %10 = vector.broadcast %cst_5 : f32 to vector<24x1xf32>
    %11 = arith.mulf %9, %10 : vector<24x1xf32>
    %12 = vector.broadcast %11 : vector<24x1xf32> to vector<24x128xf32>
    %13 = arith.subf %2, %12 : vector<24x128xf32>
    %cst_6 = arith.constant 0.000000e+00 : f32
    %14 = vector.broadcast %cst_6 : f32 to vector<24x128xf32>
    %15 = arith.select %5, %13, %14 : vector<24x128xi1>, vector<24x128xf32>
    %16 = arith.mulf %15, %15 : vector<24x128xf32>
    %cst_7 = arith.constant dense<0.000000e+00> : vector<24xf32>
    %17 = vector.multi_reduction <add>, %16, %cst_7 [1] : vector<24x128xf32> to vector<24xf32>
    %18 = vector.shape_cast %17 : vector<24xf32> to vector<24x1xf32>
    %cst_8 = arith.constant 3.125000e-02 : f32
    %19 = vector.broadcast %cst_8 : f32 to vector<24x1xf32>
    %20 = arith.mulf %18, %19 : vector<24x1xf32>
    %21 = vector.broadcast %11 : vector<24x1xf32> to vector<24x128xf32>
    %22 = arith.subf %2, %21 : vector<24x128xf32>
    %cst_9 = arith.constant 9.99999974E-6 : f32
    %23 = vector.broadcast %cst_9 : f32 to vector<24x1xf32>
    %24 = arith.addf %20, %23 : vector<24x1xf32>
    %25 = math.rsqrt %24 : vector<24x1xf32>
    %26 = vector.broadcast %25 : vector<24x1xf32> to vector<24x128xf32>
    %27 = arith.mulf %22, %26 : vector<24x128xf32>
    %c0_10 = arith.constant 0 : index
    %c0_11 = arith.constant 0 : index
    %28 = vector.load %arg4[%c0_10, %c0_11] : memref<24x1xf32, #tpu.memory_space<vmem>>, vector<24x1xf32>
    %29 = vector.broadcast %28 : vector<24x1xf32> to vector<24x128xf32>
    %30 = arith.mulf %27, %29 : vector<24x128xf32>
    %c0_12 = arith.constant 0 : index
    %c0_13 = arith.constant 0 : index
    %31 = vector.load %arg5[%c0_12, %c0_13] : memref<24x1xf32, #tpu.memory_space<vmem>>, vector<24x1xf32>
    %32 = vector.broadcast %31 : vector<24x1xf32> to vector<24x128xf32>
    %33 = arith.addf %30, %32 : vector<24x128xf32>
    %cst_14 = arith.constant 0.000000e+00 : f32
    %34 = vector.broadcast %cst_14 : f32 to vector<24x128xf32>
    %35 = arith.maximumf %33, %34 : vector<24x128xf32>
    %c24_i32 = arith.constant 24 : i32
    %36 = arith.muli %arg0, %c24_i32 : i32
    %c0_15 = arith.constant 0 : index
    %37 = memref.load %arg1[%c0_15] : memref<1xi32, #tpu.memory_space<smem>>
    %38 = tpu.iota {dimensions = array<i32: 0>} : vector<24x128xi32>
    %39 = vector.broadcast %36 : i32 to vector<24x128xi32>
    %40 = arith.addi %38, %39 : vector<24x128xi32>
    %41 = tpu.iota {dimensions = array<i32: 1>} : vector<24x128xi32>
    %c128_i32 = arith.constant 128 : i32
    %42 = vector.broadcast %c128_i32 : i32 to vector<24x128xi32>
    %43 = arith.muli %40, %42 : vector<24x128xi32>
    %44 = arith.addi %43, %41 : vector<24x128xi32>
    %45 = vector.broadcast %37 : i32 to vector<24x128xi32>
    %46 = arith.xori %44, %45 : vector<24x128xi32>
    %c2146121005_i32 = arith.constant 2146121005 : i32
    %47 = vector.broadcast %c2146121005_i32 : i32 to vector<24x128xi32>
    %48 = arith.muli %46, %47 : vector<24x128xi32>
    %c15_i32 = arith.constant 15 : i32
    %49 = vector.broadcast %c15_i32 : i32 to vector<24x128xi32>
    %50 = arith.shrsi %48, %49 : vector<24x128xi32>
    %51 = arith.xori %48, %50 : vector<24x128xi32>
    %c-2073254261_i32 = arith.constant -2073254261 : i32
    %52 = vector.broadcast %c-2073254261_i32 : i32 to vector<24x128xi32>
    %53 = arith.muli %51, %52 : vector<24x128xi32>
    %c13_i32 = arith.constant 13 : i32
    %54 = vector.broadcast %c13_i32 : i32 to vector<24x128xi32>
    %55 = arith.shrsi %53, %54 : vector<24x128xi32>
    %56 = arith.xori %53, %55 : vector<24x128xi32>
    %c668265263_i32 = arith.constant 668265263 : i32
    %57 = vector.broadcast %c668265263_i32 : i32 to vector<24x128xi32>
    %58 = arith.muli %56, %57 : vector<24x128xi32>
    %c16_i32 = arith.constant 16 : i32
    %59 = vector.broadcast %c16_i32 : i32 to vector<24x128xi32>
    %60 = arith.shrsi %58, %59 : vector<24x128xi32>
    %61 = arith.xori %58, %60 : vector<24x128xi32>
    %c1_i32 = arith.constant 1 : i32
    %62 = vector.broadcast %c1_i32 : i32 to vector<24x128xi32>
    %63 = arith.andi %61, %62 : vector<24x128xi32>
    %c0_i32 = arith.constant 0 : i32
    %64 = vector.broadcast %c0_i32 : i32 to vector<24x128xi32>
    %65 = arith.cmpi eq, %63, %64 : vector<24x128xi32>
    %cst_16 = arith.constant 0.000000e+00 : f32
    %66 = vector.broadcast %cst_16 : f32 to vector<24x128xf32>
    %67 = arith.select %65, %35, %66 : vector<24x128xi1>, vector<24x128xf32>
    %c0_17 = arith.constant 0 : index
    %c0_18 = arith.constant 0 : index
    %68 = vector.load %arg6[%c0_17, %c0_18] : memref<24x128xf32, #tpu.memory_space<vmem>>, vector<24x128xf32>
    tpu.vector_store %arg6[%c0_17, %c0_18], %67 {strides = array<i32>} : memref<24x128xf32, #tpu.memory_space<vmem>>, vector<24x128xf32>,
    return
  }
  func.func @transform_0(%arg0: i32, %arg1: memref<1xi32, #tpu.memory_space<smem>>) -> (i32, i32) {
    %c0_i32 = arith.constant 0 : i32
    %c0_i32_0 = arith.constant 0 : i32
    return %arg0, %c0_i32 : i32, i32
  }
  func.func @transform_1(%arg0: i32, %arg1: memref<1xi32, #tpu.memory_space<smem>>) -> (i32, i32) {
    %c0_i32 = arith.constant 0 : i32
    %c0_i32_0 = arith.constant 0 : i32
    %c0_i32_1 = arith.constant 0 : i32
    return %c0_i32, %c0_i32_0 : i32, i32
  }
  func.func @transform_2(%arg0: i32, %arg1: memref<1xi32, #tpu.memory_space<smem>>) -> (i32, i32) {
    %c0_i32 = arith.constant 0 : i32
    %c0_i32_0 = arith.constant 0 : i32
    return %arg0, %c0_i32 : i32, i32
  }
  func.func @transform_3(%arg0: i32, %arg1: memref<1xi32, #tpu.memory_space<smem>>) -> (i32, i32) {
    %c0_i32 = arith.constant 0 : i32
    %c0_i32_0 = arith.constant 0 : i32
    return %arg0, %c0_i32 : i32, i32
  }
  func.func @transform_4(%arg0: i32, %arg1: memref<1xi32, #tpu.memory_space<smem>>) -> (i32, i32) {
    %c0_i32 = arith.constant 0 : i32
    %c0_i32_0 = arith.constant 0 : i32
    return %arg0, %c0_i32 : i32, i32
  }
}

</mosaic_0001>

<bundles_post_ra>
// kernel: tpu_custom_call.1
= control target key start
LH: loop header
LB: loop body
LE: loop exit
PB: predicated region body
PF: predicated region fallthrough
CT: control target
= control target key end

     0   :  { %vm40_vm0 = vcmask 1043456   ;;  %vm33_vm1 = vcmask 64512   ;;  %s400_s0 = inlined_call_operand.<no memory space> [shape: s32[1], index: 0, kind: input, shape index: {}]   ;;  %s401_s1 = inlined_call_operand.vmem [shape: bf16[24,8], index: 1, kind: input, shape index: {}]   ;;  %s402_s2 = inlined_call_operand.vmem [shape: bf16[8,128], index: 2, kind: input, shape index: {}]   ;;  %s403_s3 = inlined_call_operand.vmem [shape: f32[24,1], index: 3, kind: input, shape index: {}]   ;;  %s404_s4 = inlined_call_operand.vmem [shape: f32[24,1], index: 4, kind: input, shape index: {}]   ;;  %s405_s5 = inlined_call_operand.hbm [shape: f32[24,128], index: 5, kind: output, shape index: {}]  }
   0x1   :  { %v24_v0 = vld [vmem:[%s402_s2] sm:$0xf]  ;;  %v275_v3 = vld [vmem:[%s401_s1 + $0x8] ss:$0 sps:$4 sm:$0xff]  }
   0x2   :  { %v274_v1 = vld [vmem:[%s401_s1] sm:$0xff]   ;;  %267 = vmatprep.subr.msk.bf16.mxu0 %vm40_vm0, %v24_v0  ;;  %v42_v2 = vsel %vm40_vm0, %v24_v0, 0 }
   0x3   :  { %262 = vmatpush3.bf16.msra.mxu0 %v42_v2  ;;  %263 = vmatprep.mubr.msk.bf16.mxu0 %vm33_vm1, %v274_v1 }
   0x4   :  { %11 = vsyncpa [#allocation5], 0  ;;  %v92_v4 = vlaneseq  ;;  %v306_v13 = vmov 0   ;;  %v135_v29 = vld [vmem:[%s403_s3 + $0x8] sm:$0xff]  ;;  %v136_v30 = vld [vmem:[%s403_s3 + $0x10] sm:$0xff]  ;;  %v195_v43 = vstv %s400_s0  ;;  %s307_s0 = smov [#allocation4]  }
   0x5   :  { %273 = vset.pattern.permute.xlu1 %v306_v13  ;;  %272 = vset.pattern.permute.xlu0 %v306_v13  ;;  %v134_v31 = vld [vmem:[%s403_s3] sm:$0xff]  ;;  %v156_v33 = vld [vmem:[%s404_s4 + $0x8] sm:$0xff]  ;;  %v157_v34 = vld [vmem:[%s404_s4 + $0x10] sm:$0xff] }
   0x6   :  { %264 = vmatmul.mubr.msk.bf16.vlgmr.msra.gmra.mrb[0].mxu0 %vm33_vm1, %v275_v3  ;;  %v93_v5 = vand.u32 127, %v92_v4  ;;  %v155_v32 = vld [vmem:[%s404_s4] sm:$0xff]  ;;  %v182_v35 = vshrl.u32 %v92_v4, 7  ;;  %s243_s4 = sshll.u32 %s307_s0, 4  ;;  %s244_s4 = int_to_ptr.vmem [resolvable:$true] %s243_s4 }
   0x7   :  { %s282_s10 = scalar_lea.vmem %s244_s4, 384  ;;  %p287_p1 = scmp.lt.s32.totalorder %s244_s4, %s244_s4 }
   0x8   :  { %vm94_vm2 = vcmp.lt.s32.totalorder %v93_v5, 32  ;;  %v183_v36 = vadd.s32 8, %v182_v35  ;;  %v184_v37 = vadd.s32 16, %v182_v35  ;;  %v189_v38 = vmul.u32 128, %v182_v35  ;;  %p283_p0 = scmp.ne.s32.totalorder %s244_s4, %s282_s10  ;;  %p288_p2 = scmp.lt.s32.totalorder %s282_s10, %s282_s10 }
   0xa   :  { %v190_v39 = vmul.u32 128, %v183_v36  ;;  %v191_v40 = vmul.u32 128, %v184_v37  ;;  %v192_v41 = vadd.s32 %v189_v38, %v93_v5  ;;  %p289_p3 = por %p288_p2, %p287_p1 }
   0xc   :  { %v193_v42 = vadd.s32 %v190_v39, %v93_v5  ;;  %v194_v44 = vadd.s32 %v191_v40, %v93_v5  ;;  %v196_v45 = vxor.u32 %v195_v43, %v192_v41  ;;  %p290_p4 = pnand %p289_p3, %p283_p0 }
   0xe   :  { %v197_v46 = vxor.u32 %v195_v43, %v193_v42  ;;  %v198_v47 = vxor.u32 %v195_v43, %v194_v44  ;;  %v199_v48 = vmul.u32 2146121005, %v196_v45 }
  0x10   :  { %v200_v49 = vmul.u32 2146121005, %v197_v46  ;;  %v201_v50 = vmul.u32 2146121005, %v198_v47  ;;  %v202_v51 = vshra.s32 %v199_v48, 15 }
  0x12   :  { %v203_v52 = vshra.s32 %v200_v49, 15  ;;  %v204_v53 = vshra.s32 %v201_v50, 15  ;;  %v205_v54 = vxor.u32 %v202_v51, %v199_v48 }
  0x14   :  { %v206_v55 = vxor.u32 %v203_v52, %v200_v49  ;;  %v207_v56 = vxor.u32 %v204_v53, %v201_v50  ;;  %v208_v57 = vmul.u32 2221713035, %v205_v54 }
  0x16   :  { %v209_v58 = vmul.u32 2221713035, %v206_v55  ;;  %v210_v59 = vmul.u32 2221713035, %v207_v56  ;;  %v211_v62 = vshra.s32 %v208_v57, 13 }
  0x18   :  { %v212_v63 = vshra.s32 %v209_v58, 13  ;;  %v213_v0 = vshra.s32 %v210_v59, 13  ;;  %v214_v5 = vxor.u32 %v211_v62, %v208_v57 }
  0xd9   :  { %v265_v6 = vpop.f32.mrb[0].mxu0 }
  0xda   :  { %v78_v7 = vpop.f32.mrb[1].mxu0  ;;  %v97_v8 = vsel %vm94_vm2, %v265_v6, 0.0 }
  0xdb   :  { %102 = vadd.xlane.f32.xlu1 %v97_v8  ;;  %v266_v9 = vpop.f32.mrb[2].mxu0  ;;  %v95_v10 = vsel %vm94_vm2, %v78_v7, 0.0  ;;  %v216_v8 = vxor.u32 %v213_v0, %v210_v59 }
  0xdc   :  { %98 = vadd.xlane.f32.xlu0 %v95_v10  ;;  %v81_v11 = vpop.f32.mrb[3].mxu0 }
  0xdd   :  { %v96_v12 = vsel %vm94_vm2, %v81_v11, 0.0 }
  0xe0   :  { %100 = vadd.xlane.f32.xlu0 %v96_v12  ;;  %v217_v12 = vmul.u32 668265263, %v214_v5 }
 0x168   :  { %v103_v14 = vpop.xlane.xlu1 %102 }
 0x169   :  { %v106_v15 = vmul.f32 0.03125, %v103_v14  ;;  %v99_v16 = vpop.xlane.xlu0 %98  ;;  %v219_v14 = vmul.u32 668265263, %v216_v8 }
 0x16a   :  { %v104_v17 = vmul.f32 0.03125, %v99_v16  ;;  %v220_v16 = vshra.s32 %v217_v12, 16 }
 0x16b   :  { %v352_v18 = vsub.f32 %v265_v6, %v106_v15 }
 0x16c   :  { %v354_v19 = vsub.f32 %v78_v7, %v104_v17  ;;  %v215_v7 = vxor.u32 %v212_v63, %v209_v58 }
 0x16d   :  { %v101_v20 = vpop.xlane.xlu0 %100  ;;  %v112_v21 = vsel %vm94_vm2, %v352_v18, 0.0 }
 0x16e   :  { %v105_v22 = vmul.f32 0.03125, %v101_v20  ;;  %v115_v23 = vmul.f32 %v112_v21, %v112_v21  ;;  %v110_v24 = vsel %vm94_vm2, %v354_v19, 0.0  ;;  %v218_v13 = vmul.u32 668265263, %v215_v7 }
 0x16f   :  { %v113_v26 = vmul.f32 %v110_v24, %v110_v24  ;;  %v222_v20 = vshra.s32 %v219_v14, 16 }
 0x170   :  { %v360_v25 = vsub.f32 %v81_v11, %v105_v22  ;;  %120 = vadd.xlane.f32.xlu1 %v115_v23  ;;  %v221_v17 = vshra.s32 %v218_v13, 16  ;;  %v223_v23 = vxor.u32 %v220_v16, %v217_v12 }
 0x172   :  { %v111_v27 = vsel %vm94_vm2, %v360_v25, 0.0  ;;  %v224_v24 = vxor.u32 %v221_v17, %v218_v13 }
 0x173   :  { %v114_v28 = vmul.f32 %v111_v27, %v111_v27 }
 0x174   :  { %116 = vadd.xlane.f32.xlu1 %v113_v26  ;;  %v225_v26 = vxor.u32 %v222_v20, %v219_v14  ;;  %v227_v35 = vand.u32 1, %v224_v24 }
 0x175   :  { %118 = vadd.xlane.f32.xlu0 %v114_v28 }
 0x176   :  { %v228_v37 = vand.u32 1, %v225_v26  ;;  %vm230_vm4 = vcmp.eq.s32.totalorder %v227_v35, 0 }
 0x178   :  { %vm231_vm5 = vcmp.eq.s32.totalorder %v228_v37, 0 }
 0x185   :  { %144 = vperm.xlu1 %273, %v135_v29  }
 0x189   :  { %149 = vperm.xlu1 %273, %v136_v30  }
 0x18b   :  { %139 = vperm.xlu0 %272, %v134_v31  }
 0x18d   :  { %160 = vperm.xlu1 %273, %v155_v32  }
 0x191   :  { %165 = vperm.xlu1 %273, %v156_v33  }
 0x195   :  { %170 = vperm.xlu1 %273, %v157_v34   ;;  %v226_v34 = vand.u32 1, %v223_v23 }
 0x197   :  { %vm229_vm3 = vcmp.eq.s32.totalorder %v226_v34, 0 }
 0x1fd   :  { %v121_v60 = vpop.xlane.xlu1 %120 }
 0x1fe   :  { %v124_v61 = vmul.f32 0.03125, %v121_v60 }
 0x200   :  { %v127_v1 = vadd.f32 1e-05, %v124_v61 }
 0x201   :  { %v117_v2 = vpop.xlane.xlu1 %116 }
 0x202   :  { %v122_v3 = vmul.f32 0.03125, %v117_v2  ;;  %v119_v4 = vpop.xlane.xlu0 %118  ;;  %276 = vrsqrt.f32 %v127_v1 }
 0x203   :  { %v123_v6 = vmul.f32 0.03125, %v119_v4 }
 0x204   :  { %v125_v9 = vadd.f32 1e-05, %v122_v3 }
 0x205   :  { %v126_v10 = vadd.f32 1e-05, %v123_v6  ;;  %v145_v11 = vpop.permute.xlu1 %144 }
 0x206   :  { %278 = vrsqrt.f32 %v125_v9 }
 0x207   :  { %280 = vrsqrt.f32 %v126_v10 }
 0x209   :  { %v150_v15 = vpop.permute.xlu1 %149 }
 0x20a   :  { %v140_v29 = vpop.permute.xlu0 %139 }
 0x20c   :  { %v277_v21 = vpop.eup %276 }
 0x20d   :  { %v161_v22 = vpop.permute.xlu1 %160  ;;  %v133_v28 = vmul.f32 %v277_v21, %v352_v18 }
 0x20f   :  { %v154_v39 = vmul.f32 %v150_v15, %v133_v28 }
 0x210   :  { %v279_v27 = vpop.eup %278 }
 0x211   :  { %v281_v30 = vpop.eup %280  ;;  %v166_v31 = vpop.permute.xlu1 %165  ;;  %v131_v32 = vmul.f32 %v279_v27, %v354_v19 }
 0x212   :  { %v132_v33 = vmul.f32 %v281_v30, %v360_v25 }
 0x213   :  { %v152_v36 = vmul.f32 %v140_v29, %v131_v32 }
 0x214   :  { %v153_v38 = vmul.f32 %v145_v11, %v132_v33 }
 0x215   :  { %v173_v40 = vadd.f32 %v161_v22, %v152_v36  ;;  %v171_v41 = vpop.permute.xlu1 %170 }
 0x216   :  { %v174_v42 = vadd.f32 %v166_v31, %v153_v38  ;;  %v175_v18 = vadd.f32 %v171_v41, %v154_v39 }
 0x217   :  { %v176_v43 = vmax.f32 %v173_v40, 0.0 }
 0x218   :  { %v177_v44 = vmax.f32 %v174_v42, 0.0  ;;  %v178_v19 = vmax.f32 %v175_v18, 0.0 }
 0x219   :  { %v232_v25 = vsel %vm229_vm3, %v176_v43, 0.0 }
 0x21a   :  { %v233_v45 = vsel %vm230_vm4, %v177_v44, 0.0  ;;  %235 = vst [vmem:[#allocation4] sm:$0xff] %v232_v25  ;;  %v234_v46 = vsel %vm231_vm5, %v178_v19, 0.0 }
 0x21b   :  { %236 = vst [vmem:[#allocation4 + $0x8] sm:$0xff] %v233_v45  ;;  %237 = vst [vmem:[#allocation4 + $0x10] sm:$0xff] %v234_v46 }
 0x21c   :  { %293 = shalt.err (!%p290_p4)
}
 0x21d   :  { %s294_s13 = scalar_lea.hbm %s405_s5, 384 }
 0x21e   :  { %p295_p5 = scmp.ne.s32.totalorder %s405_s5, %s294_s13  ;;  %p298_p6 = scmp.lt.u32.totalorder %s294_s13, %s405_s5 }
 0x220   :  { %p300_p7 = pnand %p298_p6, %p295_p5 }
 0x222   :  { %303 = shalt.err (!%p300_p7)
}
 0x223   :  { %s308_s18 = smov 128   ;;  %s309_s19 = smov 8  }
 0x224   :  { %249 = dma.vmem_to_hbm [thread:$0]  %s244_s4, 384, %s405_s5, [#allocation5], %s308_s18, %s308_s18, %s309_s19  }
 0x225   :  { %304 = dma.done.wait [#allocation5], 384  }
 0x226   :  { %305 = vsyncadd [#allocation5], 4294966912 }
 0x227   :  { %253 = vsyncpa [#allocation5], 1 }

</bundles_post_ra>
